<compile_context>
chip_gen: v5e
topology: v5e:2x2
jax: 0.10.0
libtpu: 0.0.40
codegen_flags: <defaults>
</compile_context>

<pallas_src>
import functools
import math

import jax
import jax.numpy as jnp
from jax import lax
from jax.experimental import pallas as pl
from jax.experimental.pallas import tpu as pltpu


def _round_up(x: int, m: int) -> int:
    return ((x + m - 1) // m) * m


def _tpu_info():
    """Best-effort (vmem_capacity_bytes, tensorcores) for the local TPU."""
    vmem = 64 * 2 ** 20            # conservative default = v7x per-TC VMEM
    cores = 1
    try:
        info = pltpu.get_tpu_info()
        cap = getattr(info, "vmem_capacity_bytes", None)
        if cap:
            vmem = int(cap)
        for name in ("num_tensorcores", "tensorcores_per_chip", "num_cores",
                     "core_count", "cores_per_chip"):
            v = getattr(info, name, None)
            if isinstance(v, int) and v > 1:
                cores = int(v)
                break
    except Exception:
        pass
    return vmem, cores


def _tile_vmem_bytes(tn_out, tn_in, halo, d_in, d_out, k, d_col,
                     in_bytes, out_bytes, fused):
    """Rough per-grid-step VMEM working set (double-buffered IO + temps)."""
    n_ext = tn_in + 2 * halo
    total = (2 * tn_in * d_in * in_bytes       # main input tile (double-buffered)
             + 4 * halo * d_in * in_bytes      # two halo tiles (double-buffered)
             + 2 * tn_out * d_out * out_bytes  # output tile (double-buffered)
             + n_ext * d_in * 2                # bf16 assembled input tile (scratch)
             + tn_out * d_out * 4)             # f32 accumulator
    if fused:
        total += n_ext * k * d_col * 4         # f32 fused matmul result z
    else:
        total += tn_out * d_in * 2 + tn_out * d_out * 4   # per-tap lhs + partial
    return total


def _conv1d_kernel(x_ref, lh_ref, rh_ref, w_ref, b_ref, o_ref, xext_ref, *,
                   n_time: int, k_taps: int, dilation: int, stride: int,
                   pad: int, halo: int, fused: bool):
    """One (batch, time-tile) grid step.

    x_ref:    (1, TN_in, D_in)   main input rows [t*TN_in, (t+1)*TN_in)
    lh_ref:   (1, HALO,  D_in)   rows intended to be [t*TN_in - HALO, t*TN_in)
    rh_ref:   (1, HALO,  D_in)   rows intended to be [(t+1)*TN_in, +HALO)
    w_ref:    fused:   (D_in, K*D_col) bf16 flattened weight, lane-padded taps
              per-tap: (K, D_in, D_out) bf16
    b_ref:    (1, D_out)         f32 bias
    o_ref:    (1, TN_out, D_out) output rows [t*TN_out, (t+1)*TN_out)
    xext_ref: (TN_in + 2*HALO, D_in) bf16 scratch: zero-padded assembled tile
    """
    t = pl.program_id(1)
    tn_in, d_in = x_ref.shape[1], x_ref.shape[2]
    tn_out, d_out = o_ref.shape[1], o_ref.shape[2]
    row0 = t * tn_in                           # global row of x_ref[0, 0]

    # ---- assemble the zero-padded input tile (bf16) in VMEM.  Masking is
    # gated with pl.when so interior tiles pay only a cast + store.

    # Left halo: intended rows [row0-HALO, row0).  For t > 0 they are always
    # in-bounds (row0 >= TN_in >= HALO and row0 <= N-1); for t == 0 they are
    # all negative -> zero the whole strip.
    @pl.when(t == 0)
    def _():
        xext_ref[0:halo, :] = jnp.zeros((halo, d_in), jnp.bfloat16)

    @pl.when(t != 0)
    def _():
        xext_ref[0:halo, :] = lh_ref[0].astype(jnp.bfloat16)

    # Main tile: rows [row0, row0+TN_in); only the last (partial) tile needs
    # the g < N mask.
    main_needs_mask = row0 + tn_in > n_time

    @pl.when(main_needs_mask)
    def _():
        g = row0 + lax.broadcasted_iota(jnp.int32, (tn_in, 1), 0)
        piece = x_ref[0]
        xext_ref[halo:halo + tn_in, :] = jnp.where(
            g < n_time, piece, jnp.zeros_like(piece)).astype(jnp.bfloat16)

    @pl.when(jnp.logical_not(main_needs_mask))
    def _():
        xext_ref[halo:halo + tn_in, :] = x_ref[0].astype(jnp.bfloat16)

    # Right halo: intended rows [row0+TN_in, +HALO).  Because TN_in is a
    # multiple of HALO, whenever the halo block index is clamped at the end of
    # the array every intended row is >= N, so the mask zeroes the whole strip
    # (this is the invariant that makes the clamped BlockSpec correct).
    g0_r = row0 + tn_in
    right_needs_mask = g0_r + halo > n_time

    @pl.when(right_needs_mask)
    def _():
        g = g0_r + lax.broadcasted_iota(jnp.int32, (halo, 1), 0)
        piece = rh_ref[0]
        xext_ref[halo + tn_in:halo + tn_in + halo, :] = jnp.where(
            g < n_time, piece, jnp.zeros_like(piece)).astype(jnp.bfloat16)

    @pl.when(jnp.logical_not(right_needs_mask))
    def _():
        xext_ref[halo + tn_in:halo + tn_in + halo, :] = (
            rh_ref[0].astype(jnp.bfloat16))

    # ---- convolution
    acc = jnp.broadcast_to(b_ref[...].astype(jnp.float32), (tn_out, d_out))
    base = halo - pad

    if fused:
        # One fused MXU matmul for all K taps (bf16 in, f32 accumulate):
        #   z[r, k*D_col + c] = sum_d x_ext[r, d] * W[k, d, c]   (c < D_out)
        d_col = w_ref.shape[1] // k_taps
        z = jnp.dot(xext_ref[...], w_ref[...],
                    preferred_element_type=jnp.float32)
        # Shift-add epilogue; per-tap column blocks start on 128-lane borders.
        for k in range(k_taps):                       # K is small & static
            start = base + k * dilation               # fused => stride == 1
            acc = acc + z[start:start + tn_out, k * d_col:k * d_col + d_out]
    else:
        # Per-tap matmuls on the strided row subset: saves `stride`x MXU FLOPs
        # and keeps the f32 intermediate at (TN_out, D_out).
        for k in range(k_taps):
            start = base + k * dilation
            if stride == 1:
                lhs = xext_ref[pl.ds(start, tn_out), :]
            else:
                lhs = xext_ref[pl.ds(start, tn_out, stride), :]
            acc = acc + jnp.dot(lhs, w_ref[k],
                                preferred_element_type=jnp.float32)

    o_ref[0] = acc.astype(o_ref.dtype)


class CNNLayerPallas:
    """Pallas equivalent of CNNLayer (single 1D dilated CNN layer)."""

    def __init__(self, input_dim: int, output_dim: int, kernel_size: int = 5,
                 dilation: int = 2, stride: int = 1, key=None,
                 max_time_tile: int | None = None):
        if not kernel_size % 2:
            kernel_size += 1
        self.input_dim = input_dim
        self.output_dim = output_dim
        self.kernel_size = kernel_size
        self.dilation = dilation
        self.stride = stride
        self.padding = int(dilation * (kernel_size - 1) / 2)
        self.max_time_tile = max_time_tile        # test hook: cap the time tile

        if key is None:
            key = jax.random.PRNGKey(0)
        kw, kb = jax.random.split(key)
        # PyTorch Conv1d default init: U(-bound, bound), bound = 1/sqrt(C_in*K)
        bound = 1.0 / math.sqrt(input_dim * kernel_size)
        w = jax.random.uniform(
            kw, (kernel_size, input_dim, output_dim), jnp.float32, -bound, bound)
        # Store in bf16 (native MXU input dtype; halves weight DMA / VMEM).
        self.weight = w.astype(jnp.bfloat16)                    # (K, D_in, D_out)
        self.bias = jax.random.uniform(
            kb, (1, output_dim), jnp.float32, -bound, bound)

        # Matmul strategy is static: fused single matmul when stride == 1 and
        # D_out is modest; otherwise per-tap matmuls on strided LHS rows.
        self.fused = (stride == 1) and (output_dim < 256)
        if self.fused:
            # Lane-pad each tap's column block to a 128 multiple so the
            # epilogue tap extraction starts on vreg lane boundaries.
            d_col = output_dim if output_dim % 128 == 0 else _round_up(output_dim, 128)
            w_pad = jnp.zeros((kernel_size, input_dim, d_col), jnp.bfloat16)
            w_pad = w_pad.at[:, :, :output_dim].set(self.weight)
            # Tap-minor flattened layout for the fused matmul: (D_in, K*D_col).
            self.w_mxu = jnp.reshape(jnp.transpose(w_pad, (1, 0, 2)),
                                     (input_dim, kernel_size * d_col))
            self.d_col = d_col
        else:
            self.w_mxu = self.weight                             # (K, D_in, D_out)
            self.d_col = output_dim

    def get_output_lengths(self, input_lengths):
        s = self.stride
        return [int((ln + s - 1) / s) for ln in input_lengths]

    def __call__(self, x: dict):
        feats = x["features"]                                    # (B, N, D_in)
        B, N, D_in = feats.shape
        assert D_in == self.input_dim
        K, dil, st, pad = self.kernel_size, self.dilation, self.stride, self.padding
        D_out, d_col, fused = self.output_dim, self.d_col, self.fused

        n_out = (N + 2 * pad - dil * (K - 1) - 1) // st + 1
        # bf16 packs two rows per sublane -> keep all time offsets multiples of 16.
        halo = 16 * max(1, -(-pad // 16))

        # ---- generation-aware tile / VMEM budgeting.
        vmem_cap, n_cores = _tpu_info()
        big_vmem = vmem_cap >= 96 * 2 ** 20            # v5e/v6e (128 MiB VMEM)
        budget = (28 if big_vmem else 13) * 2 ** 20    # per-grid-step working set
        row_cap = 4096 if big_vmem else 1024
        limit_cap = (96 if big_vmem else 40) * 2 ** 20

        g = 16                                          # output-row granularity
        while (g * st) % halo:
            g += 16
        in_bytes = feats.dtype.itemsize
        out_bytes = in_bytes
        tn_out = min(_round_up(n_out, g), _round_up(row_cap, g))
        if self.max_time_tile is not None:
            tn_out = min(tn_out, max(g, _round_up(self.max_time_tile, g)))
        while tn_out > g and _tile_vmem_bytes(
                tn_out, tn_out * st, halo, D_in, D_out, K, d_col,
                in_bytes, out_bytes, fused) > budget:
            tn_out -= g
        tn_in = tn_out * st
        n_t = -(-n_out // tn_out)
        assert tn_in % halo == 0                        # required by halo clamping
        tb = tn_in // halo                # main-tile size measured in halo blocks
        last_halo_blk = -(-N // halo) - 1               # last in-bounds halo block

        kernel = functools.partial(
            _conv1d_kernel, n_time=N, k_taps=K, dilation=dil, stride=st,
            pad=pad, halo=halo, fused=fused)

        est = _tile_vmem_bytes(tn_out, tn_in, halo, D_in, D_out, K, d_col,
                               in_bytes, out_bytes, fused)
        w_bytes = self.w_mxu.size * 2 + self.bias.size * 4
        vmem_limit = int(min(limit_cap,
                             max(32 * 2 ** 20, 2 * est + 2 * w_bytes + (4 << 20))))

        cost = pl.CostEstimate(
            flops=2 * B * n_out * K * D_in * D_out,
            transcendentals=0,
            bytes_accessed=(feats.size * in_bytes + w_bytes
                            + B * n_out * D_out * out_bytes))

        def launch(dim_sems, single_buffer_resident):
            # Grid-resident weights/bias: single-buffer them when supported.
            res_kw = ({"pipeline_mode": pl.Buffered(1)}
                      if single_buffer_resident else {})
            if fused:
                w_spec = pl.BlockSpec((D_in, K * d_col),
                                      lambda b, t: (0, 0), **res_kw)
            else:
                w_spec = pl.BlockSpec((K, D_in, D_out),
                                      lambda b, t: (0, 0, 0), **res_kw)
            b_spec = pl.BlockSpec((1, D_out), lambda b, t: (0, 0), **res_kw)
            return pl.pallas_call(
                kernel,
                out_shape=jax.ShapeDtypeStruct((B, n_out, D_out), feats.dtype),
                grid_spec=pltpu.PrefetchScalarGridSpec(
                    num_scalar_prefetch=0,
                    grid=(B, n_t),
                    in_specs=[
                        # main tile: rows [t*tn_in, (t+1)*tn_in)
                        pl.BlockSpec((1, tn_in, D_in), lambda b, t: (b, t, 0)),
                        # left halo: rows [t*tn_in - halo, t*tn_in), clamped at 0
                        # (for t == 0 the kernel zeroes the whole strip)
                        pl.BlockSpec((1, halo, D_in),
                                     lambda b, t: (b, jnp.maximum(t * tb - 1, 0), 0)),
                        # right halo: rows [(t+1)*tn_in, +halo), clamped at the
                        # end (a clamped block is fully masked in-kernel)
                        pl.BlockSpec((1, halo, D_in),
                                     lambda b, t: (b, jnp.minimum((t + 1) * tb,
                                                                  last_halo_blk), 0)),
                        w_spec,
                        b_spec,
                    ],
                    # Last partial time tile relies on Pallas edge clipping of
                    # the output block (exercised by the multi-tile self-test).
                    out_specs=pl.BlockSpec((1, tn_out, D_out),
                                           lambda b, t: (b, t, 0)),
                    scratch_shapes=[pltpu.VMEM((tn_in + 2 * halo, D_in),
                                               jnp.bfloat16)],
                ),
                compiler_params=pltpu.CompilerParams(
                    dimension_semantics=dim_sems,
                    vmem_limit_bytes=vmem_limit),
                cost_estimate=cost,
            )(feats, feats, feats, self.w_mxu, self.bias)

        # Attempt order: (1) explicit core-parallel time axis on multi-TC chips
        # (v7x) + single-buffered resident weights, (2) standard semantics +
        # single-buffered weights, (3) fully conservative fallback.
        attempts = []
        if n_cores > 1:
            attempts.append(((pltpu.PARALLEL, pltpu.CORE_PARALLEL), True))
        attempts.append(((pltpu.PARALLEL, pltpu.ARBITRARY), True))
        attempts.append((("parallel", "arbitrary"), False))

        out, errs = None, []
        for sems, single_buf in attempts:
            try:
                out = launch(sems, single_buf)
                break
            except Exception as e:      # noqa: BLE001 - fall back to proven config
                errs.append(e)
        if out is None:
            raise errs[-1]

        y = {k: v for k, v in x.items()}
        y["features"] = out
        y["lengths"] = self.get_output_lengths(x["lengths"])
        return y


def _reference_conv1d(feats, weight_taps, bias, dilation, stride, padding):
    # feats: (B, N, D_in) f32; weight_taps: (K, D_in, D_out) f32
    x_ncw = jnp.transpose(feats, (0, 2, 1))              # (B, C_in, N)
    w_oik = jnp.transpose(weight_taps, (2, 1, 0))        # (C_out, C_in, K)
    out = lax.conv_general_dilated(
        x_ncw, w_oik,
        window_strides=(stride,),
        padding=[(padding, padding)],
        rhs_dilation=(dilation,),
        dimension_numbers=("NCH", "OIH", "NCH"),
    )
    out = out + bias.reshape(1, -1, 1)
    return jnp.transpose(out, (0, 2, 1))                 # (B, N_out, C_out)


if __name__ == "__main__":
    root_key = jax.random.PRNGKey(0)

    def check(B, N, D_in, D_out, kernel_size, dilation, stride, max_tile, tag):
        kf, kl = jax.random.split(jax.random.fold_in(root_key, tag))
        feats = jax.random.normal(kf, (B, N, D_in), jnp.float32)
        lengths = [N, max(1, N - 3)][:B]

        layer = CNNLayerPallas(input_dim=D_in, output_dim=D_out,
                               kernel_size=kernel_size, dilation=dilation,
                               stride=stride, key=kl, max_time_tile=max_tile)

        y = layer({"features": feats, "lengths": lengths, "meta": "example"})
        out = jax.block_until_ready(y["features"])

        # Reference on the same bf16-quantized activations/weights, f32 math.
        feats_q = feats.astype(jnp.bfloat16).astype(jnp.float32)
        w_q = layer.weight.astype(jnp.float32)
        ref = _reference_conv1d(feats_q, w_q, layer.bias,
                                layer.dilation, layer.stride, layer.padding)
        ref = jax.block_until_ready(ref)

        assert out.shape == ref.shape, (tag, out.shape, ref.shape)
        assert y["lengths"] == layer.get_output_lengths(lengths)
        max_err = float(jnp.max(jnp.abs(out - ref)))
        assert max_err < 2e-3, (tag, max_err)

    # 1) small shapes from the module brief (single tile, fused MXU path).
    check(B=2, N=16, D_in=8, D_out=16, kernel_size=5, dilation=2, stride=1,
          max_tile=None, tag=0)
    # 2) multi-tile time axis: interior (unmasked) tiles, clamped halos and a
    #    partial last output tile (Pallas edge clipping).
    check(B=2, N=200, D_in=8, D_out=16, kernel_size=5, dilation=2, stride=1,
          max_tile=64, tag=1)
    # 3) stride > 1 exercises the per-tap (strided-LHS) MXU path.
    check(B=1, N=37, D_in=8, D_out=16, kernel_size=5, dilation=2, stride=2,
          max_tile=16, tag=2)

    print("KERNEL_OK")
</pallas_src>

<mosaic_0001>
module attributes {stable_mosaic.version = 11 : i64} {
  func.func @_conv1d_kernel(%arg0: i32, %arg1: i32, %arg2: memref<1x16x8xf32, #tpu.memory_space<vmem>>, %arg3: memref<1x16x8xf32, #tpu.memory_space<vmem>>, %arg4: memref<1x16x8xf32, #tpu.memory_space<vmem>>, %arg5: memref<8x640xbf16, #tpu.memory_space<vmem>>, %arg6: memref<1x16xf32, #tpu.memory_space<vmem>>, %arg7: memref<1x16x16xf32, #tpu.memory_space<vmem>>, %arg8: memref<48x8xbf16, #tpu.memory_space<vmem>>) attributes {dimension_semantics = [#tpu.dimension_semantics<parallel>, #tpu.dimension_semantics<arbitrary>], iteration_bounds = array<i64: 2, 1>, scalar_prefetch = 0 : i64, scratch_operands = 1 : i64, tpu.core_type = #tpu.core_type<tc>, window_params = [{transform_indices = @transform_0, window_bounds = array<i64: 1, 16, 8>}, {transform_indices = @transform_1, window_bounds = array<i64: 1, 16, 8>}, {transform_indices = @transform_2, window_bounds = array<i64: 1, 16, 8>}, {pipeline_mode = #tpu.pipeline_mode<synchronous>, transform_indices = @transform_3, window_bounds = array<i64: 8, 640>}, {pipeline_mode = #tpu.pipeline_mode<synchronous>, transform_indices = @transform_4, window_bounds = array<i64: 1, 16>}, {transform_indices = @transform_5, window_bounds = array<i64: 1, 16, 16>}]} {
    %c16_i32 = arith.constant 16 : i32
    %0 = arith.muli %arg1, %c16_i32 : i32
    %c0_i32 = arith.constant 0 : i32
    %1 = arith.cmpi eq, %arg1, %c0_i32 : i32
    %2 = arith.extui %1 : i1 to i32
    %c0_i32_0 = arith.constant 0 : i32
    %3 = arith.cmpi ne, %2, %c0_i32_0 : i32
    scf.if %3 {
      %cst_21 = arith.constant 0.000000e+00 : bf16
      %41 = vector.broadcast %cst_21 : bf16 to vector<16x8xbf16>
      %c0_22 = arith.constant 0 : index
      %c0_23 = arith.constant 0 : index
      %42 = vector.load %arg8[%c0_22, %c0_23] : memref<48x8xbf16, #tpu.memory_space<vmem>>, vector<16x8xbf16>
      tpu.vector_store %arg8[%c0_22, %c0_23], %41 {strides = array<i32>} : memref<48x8xbf16, #tpu.memory_space<vmem>>, vector<16x8xbf16>,
    } else {
    }
    %c0_i32_1 = arith.constant 0 : i32
    %4 = arith.cmpi ne, %arg1, %c0_i32_1 : i32
    %5 = arith.extui %4 : i1 to i32
    %c0_i32_2 = arith.constant 0 : i32
    %6 = arith.cmpi ne, %5, %c0_i32_2 : i32
    scf.if %6 {
      %c0_21 = arith.constant 0 : index
      %c0_22 = arith.constant 0 : index
      %c0_23 = arith.constant 0 : index
      %41 = vector.load %arg3[%c0_21, %c0_22, %c0_23] : memref<1x16x8xf32, #tpu.memory_space<vmem>>, vector<1x16x8xf32>
      %42 = vector.shape_cast %41 : vector<1x16x8xf32> to vector<16x8xf32>
      %43 = arith.truncf %42 : vector<16x8xf32> to vector<16x8xbf16>
      %c0_24 = arith.constant 0 : index
      %c0_25 = arith.constant 0 : index
      %44 = vector.load %arg8[%c0_24, %c0_25] : memref<48x8xbf16, #tpu.memory_space<vmem>>, vector<16x8xbf16>
      tpu.vector_store %arg8[%c0_24, %c0_25], %43 {strides = array<i32>} : memref<48x8xbf16, #tpu.memory_space<vmem>>, vector<16x8xbf16>,
    } else {
    }
    %c16_i32_3 = arith.constant 16 : i32
    %7 = arith.addi %0, %c16_i32_3 : i32
    %c16_i32_4 = arith.constant 16 : i32
    %8 = arith.cmpi sgt, %7, %c16_i32_4 : i32
    %9 = arith.extui %8 : i1 to i32
    %c0_i32_5 = arith.constant 0 : i32
    %10 = arith.cmpi ne, %9, %c0_i32_5 : i32
    scf.if %10 {
      %41 = tpu.iota {dimensions = array<i32: 0>} : vector<16x1xi32>
      %42 = vector.broadcast %0 : i32 to vector<16x1xi32>
      %43 = arith.addi %42, %41 : vector<16x1xi32>
      %c0_21 = arith.constant 0 : index
      %c0_22 = arith.constant 0 : index
      %c0_23 = arith.constant 0 : index
      %44 = vector.load %arg2[%c0_21, %c0_22, %c0_23] : memref<1x16x8xf32, #tpu.memory_space<vmem>>, vector<1x16x8xf32>
      %45 = vector.shape_cast %44 : vector<1x16x8xf32> to vector<16x8xf32>
      %c16_i32_24 = arith.constant 16 : i32
      %46 = vector.broadcast %c16_i32_24 : i32 to vector<16x1xi32>
      %47 = arith.cmpi slt, %43, %46 : vector<16x1xi32>
      %cst_25 = arith.constant 0.000000e+00 : f32
      %48 = vector.broadcast %cst_25 : f32 to vector<16x8xf32>
      %49 = vector.shape_cast %47 : vector<16x1xi1> to vector<16x1xi1>
      %50 = vector.broadcast %49 : vector<16x1xi1> to vector<16x8xi1>
      %51 = arith.select %50, %45, %48 : vector<16x8xi1>, vector<16x8xf32>
      %52 = arith.truncf %51 : vector<16x8xf32> to vector<16x8xbf16>
      %c16 = arith.constant 16 : index
      %c0_26 = arith.constant 0 : index
      %53 = vector.load %arg8[%c16, %c0_26] : memref<48x8xbf16, #tpu.memory_space<vmem>>, vector<16x8xbf16>
      tpu.vector_store %arg8[%c16, %c0_26], %52 {strides = array<i32>} : memref<48x8xbf16, #tpu.memory_space<vmem>>, vector<16x8xbf16>,
    } else {
    }
    %true = arith.constant true
    %11 = arith.xori %8, %true : i1
    %12 = arith.extui %11 : i1 to i32
    %c0_i32_6 = arith.constant 0 : i32
    %13 = arith.cmpi ne, %12, %c0_i32_6 : i32
    scf.if %13 {
      %c0_21 = arith.constant 0 : index
      %c0_22 = arith.constant 0 : index
      %c0_23 = arith.constant 0 : index
      %41 = vector.load %arg2[%c0_21, %c0_22, %c0_23] : memref<1x16x8xf32, #tpu.memory_space<vmem>>, vector<1x16x8xf32>
      %42 = vector.shape_cast %41 : vector<1x16x8xf32> to vector<16x8xf32>
      %43 = arith.truncf %42 : vector<16x8xf32> to vector<16x8xbf16>
      %c16 = arith.constant 16 : index
      %c0_24 = arith.constant 0 : index
      %44 = vector.load %arg8[%c16, %c0_24] : memref<48x8xbf16, #tpu.memory_space<vmem>>, vector<16x8xbf16>
      tpu.vector_store %arg8[%c16, %c0_24], %43 {strides = array<i32>} : memref<48x8xbf16, #tpu.memory_space<vmem>>, vector<16x8xbf16>,
    } else {
    }
    %c16_i32_7 = arith.constant 16 : i32
    %14 = arith.addi %0, %c16_i32_7 : i32
    %c16_i32_8 = arith.constant 16 : i32
    %15 = arith.addi %14, %c16_i32_8 : i32
    %c16_i32_9 = arith.constant 16 : i32
    %16 = arith.cmpi sgt, %15, %c16_i32_9 : i32
    %17 = arith.extui %16 : i1 to i32
    %c0_i32_10 = arith.constant 0 : i32
    %18 = arith.cmpi ne, %17, %c0_i32_10 : i32
    scf.if %18 {
      %41 = tpu.iota {dimensions = array<i32: 0>} : vector<16x1xi32>
      %42 = vector.broadcast %14 : i32 to vector<16x1xi32>
      %43 = arith.addi %42, %41 : vector<16x1xi32>
      %c0_21 = arith.constant 0 : index
      %c0_22 = arith.constant 0 : index
      %c0_23 = arith.constant 0 : index
      %44 = vector.load %arg4[%c0_21, %c0_22, %c0_23] : memref<1x16x8xf32, #tpu.memory_space<vmem>>, vector<1x16x8xf32>
      %45 = vector.shape_cast %44 : vector<1x16x8xf32> to vector<16x8xf32>
      %c16_i32_24 = arith.constant 16 : i32
      %46 = vector.broadcast %c16_i32_24 : i32 to vector<16x1xi32>
      %47 = arith.cmpi slt, %43, %46 : vector<16x1xi32>
      %cst_25 = arith.constant 0.000000e+00 : f32
      %48 = vector.broadcast %cst_25 : f32 to vector<16x8xf32>
      %49 = vector.shape_cast %47 : vector<16x1xi1> to vector<16x1xi1>
      %50 = vector.broadcast %49 : vector<16x1xi1> to vector<16x8xi1>
      %51 = arith.select %50, %45, %48 : vector<16x8xi1>, vector<16x8xf32>
      %52 = arith.truncf %51 : vector<16x8xf32> to vector<16x8xbf16>
      %c32 = arith.constant 32 : index
      %c0_26 = arith.constant 0 : index
      %53 = vector.load %arg8[%c32, %c0_26] : memref<48x8xbf16, #tpu.memory_space<vmem>>, vector<16x8xbf16>
      tpu.vector_store %arg8[%c32, %c0_26], %52 {strides = array<i32>} : memref<48x8xbf16, #tpu.memory_space<vmem>>, vector<16x8xbf16>,
    } else {
    }
    %true_11 = arith.constant true
    %19 = arith.xori %16, %true_11 : i1
    %20 = arith.extui %19 : i1 to i32
    %c0_i32_12 = arith.constant 0 : i32
    %21 = arith.cmpi ne, %20, %c0_i32_12 : i32
    scf.if %21 {
      %c0_21 = arith.constant 0 : index
      %c0_22 = arith.constant 0 : index
      %c0_23 = arith.constant 0 : index
      %41 = vector.load %arg4[%c0_21, %c0_22, %c0_23] : memref<1x16x8xf32, #tpu.memory_space<vmem>>, vector<1x16x8xf32>
      %42 = vector.shape_cast %41 : vector<1x16x8xf32> to vector<16x8xf32>
      %43 = arith.truncf %42 : vector<16x8xf32> to vector<16x8xbf16>
      %c32 = arith.constant 32 : index
      %c0_24 = arith.constant 0 : index
      %44 = vector.load %arg8[%c32, %c0_24] : memref<48x8xbf16, #tpu.memory_space<vmem>>, vector<16x8xbf16>
      tpu.vector_store %arg8[%c32, %c0_24], %43 {strides = array<i32>} : memref<48x8xbf16, #tpu.memory_space<vmem>>, vector<16x8xbf16>,
    } else {
    }
    %c0 = arith.constant 0 : index
    %c0_13 = arith.constant 0 : index
    %22 = vector.load %arg6[%c0, %c0_13] : memref<1x16xf32, #tpu.memory_space<vmem>>, vector<1x16xf32>
    %23 = vector.shape_cast %22 : vector<1x16xf32> to vector<1x16xf32>
    %24 = vector.broadcast %23 : vector<1x16xf32> to vector<16x16xf32>
    %c0_14 = arith.constant 0 : index
    %c0_15 = arith.constant 0 : index
    %25 = vector.load %arg8[%c0_14, %c0_15] : memref<48x8xbf16, #tpu.memory_space<vmem>>, vector<48x8xbf16>
    %c0_16 = arith.constant 0 : index
    %c0_17 = arith.constant 0 : index
    %26 = vector.load %arg5[%c0_16, %c0_17] : memref<8x640xbf16, #tpu.memory_space<vmem>>, vector<8x640xbf16>
    %cst = arith.constant dense<0.000000e+00> : vector<48x640xf32>
    %27 = tpu.matmul %25, %26, %cst {dimension_numbers = #tpu.dot_dimension_numbers<[1], [0], [0], [1], [0, 0, 1, 1], [], []>} : vector<48x8xbf16>, vector<8x640xbf16>, vector<48x640xf32> -> vector<48x640xf32>
    %28 = vector.extract_strided_slice %27 {offsets = [12, 0], sizes = [16, 16], strides = [1, 1]} : vector<48x640xf32> to vector<16x16xf32>
    %29 = arith.addf %24, %28 : vector<16x16xf32>
    %30 = vector.extract_strided_slice %27 {offsets = [14, 128], sizes = [16, 16], strides = [1, 1]} : vector<48x640xf32> to vector<16x16xf32>
    %31 = arith.addf %29, %30 : vector<16x16xf32>
    %32 = vector.extract_strided_slice %27 {offsets = [16, 256], sizes = [16, 16], strides = [1, 1]} : vector<48x640xf32> to vector<16x16xf32>
    %33 = arith.addf %31, %32 : vector<16x16xf32>
    %34 = vector.extract_strided_slice %27 {offsets = [18, 384], sizes = [16, 16], strides = [1, 1]} : vector<48x640xf32> to vector<16x16xf32>
    %35 = arith.addf %33, %34 : vector<16x16xf32>
    %36 = vector.extract_strided_slice %27 {offsets = [20, 512], sizes = [16, 16], strides = [1, 1]} : vector<48x640xf32> to vector<16x16xf32>
    %37 = arith.addf %35, %36 : vector<16x16xf32>
    %c0_18 = arith.constant 0 : index
    %c0_19 = arith.constant 0 : index
    %c0_20 = arith.constant 0 : index
    %38 = vector.load %arg7[%c0_18, %c0_19, %c0_20] : memref<1x16x16xf32, #tpu.memory_space<vmem>>, vector<1x16x16xf32>
    %39 = vector.shape_cast %38 : vector<1x16x16xf32> to vector<16x16xf32>
    %40 = vector.shape_cast %37 : vector<16x16xf32> to vector<1x16x16xf32>
    tpu.vector_store %arg7[%c0_18, %c0_19, %c0_20], %40 {strides = array<i32>} : memref<1x16x16xf32, #tpu.memory_space<vmem>>, vector<1x16x16xf32>,
    return
  }
  func.func @transform_0(%arg0: i32, %arg1: i32) -> (i32, i32, i32) {
    %c0_i32 = arith.constant 0 : i32
    %c0_i32_0 = arith.constant 0 : i32
    return %arg0, %arg1, %c0_i32 : i32, i32, i32
  }
  func.func @transform_1(%arg0: i32, %arg1: i32) -> (i32, i32, i32) {
    %c1_i32 = arith.constant 1 : i32
    %0 = arith.muli %arg1, %c1_i32 : i32
    %c1_i32_0 = arith.constant 1 : i32
    %1 = arith.subi %0, %c1_i32_0 : i32
    %c0_i32 = arith.constant 0 : i32
    %2 = arith.maxsi %1, %c0_i32 : i32
    %c0_i32_1 = arith.constant 0 : i32
    %c0_i32_2 = arith.constant 0 : i32
    return %arg0, %2, %c0_i32_1 : i32, i32, i32
  }
  func.func @transform_2(%arg0: i32, %arg1: i32) -> (i32, i32, i32) {
    %c1_i32 = arith.constant 1 : i32
    %0 = arith.addi %arg1, %c1_i32 : i32
    %c1_i32_0 = arith.constant 1 : i32
    %1 = arith.muli %0, %c1_i32_0 : i32
    %c0_i32 = arith.constant 0 : i32
    %2 = arith.minsi %1, %c0_i32 : i32
    %c0_i32_1 = arith.constant 0 : i32
    %c0_i32_2 = arith.constant 0 : i32
    return %arg0, %2, %c0_i32_1 : i32, i32, i32
  }
  func.func @transform_3(%arg0: i32, %arg1: i32) -> (i32, i32) {
    %c0_i32 = arith.constant 0 : i32
    %c0_i32_0 = arith.constant 0 : i32
    %c0_i32_1 = arith.constant 0 : i32
    return %c0_i32, %c0_i32_0 : i32, i32
  }
  func.func @transform_4(%arg0: i32, %arg1: i32) -> (i32, i32) {
    %c0_i32 = arith.constant 0 : i32
    %c0_i32_0 = arith.constant 0 : i32
    %c0_i32_1 = arith.constant 0 : i32
    return %c0_i32, %c0_i32_0 : i32, i32
  }
  func.func @transform_5(%arg0: i32, %arg1: i32) -> (i32, i32, i32) {
    %c0_i32 = arith.constant 0 : i32
    %c0_i32_0 = arith.constant 0 : i32
    return %arg0, %arg1, %c0_i32 : i32, i32, i32
  }
}

module attributes {stable_mosaic.version = 11 : i64} {
  func.func @_conv1d_kernel(%arg0: i32, %arg1: i32, %arg2: memref<1x16x8xf32, #tpu.memory_space<vmem>>, %arg3: memref<1x16x8xf32, #tpu.memory_space<vmem>>, %arg4: memref<1x16x8xf32, #tpu.memory_space<vmem>>, %arg5: memref<8x640xbf16, #tpu.memory_space<vmem>>, %arg6: memref<1x16xf32, #tpu.memory_space<vmem>>, %arg7: memref<1x16x16xf32, #tpu.memory_space<vmem>>, %arg8: memref<48x8xbf16, #tpu.memory_space<vmem>>) attributes {dimension_semantics = [#tpu.dimension_semantics<parallel>, #tpu.dimension_semantics<arbitrary>], iteration_bounds = array<i64: 2, 1>, scalar_prefetch = 0 : i64, scratch_operands = 1 : i64, tpu.core_type = #tpu.core_type<tc>, window_params = [{transform_indices = @transform_0, window_bounds = array<i64: 1, 16, 8>}, {transform_indices = @transform_1, window_bounds = array<i64: 1, 16, 8>}, {transform_indices = @transform_2, window_bounds = array<i64: 1, 16, 8>}, {pipeline_mode = #tpu.pipeline_mode<synchronous>, transform_indices = @transform_3, window_bounds = array<i64: 8, 640>}, {pipeline_mode = #tpu.pipeline_mode<synchronous>, transform_indices = @transform_4, window_bounds = array<i64: 1, 16>}, {transform_indices = @transform_5, window_bounds = array<i64: 1, 16, 16>}]} {
    %c16_i32 = arith.constant 16 : i32
    %0 = arith.muli %arg1, %c16_i32 : i32
    %c0_i32 = arith.constant 0 : i32
    %1 = arith.cmpi eq, %arg1, %c0_i32 : i32
    %2 = arith.extui %1 : i1 to i32
    %c0_i32_0 = arith.constant 0 : i32
    %3 = arith.cmpi ne, %2, %c0_i32_0 : i32
    scf.if %3 {
      %cst_21 = arith.constant 0.000000e+00 : bf16
      %41 = vector.broadcast %cst_21 : bf16 to vector<16x8xbf16>
      %c0_22 = arith.constant 0 : index
      %c0_23 = arith.constant 0 : index
      %42 = vector.load %arg8[%c0_22, %c0_23] : memref<48x8xbf16, #tpu.memory_space<vmem>>, vector<16x8xbf16>
      tpu.vector_store %arg8[%c0_22, %c0_23], %41 {strides = array<i32>} : memref<48x8xbf16, #tpu.memory_space<vmem>>, vector<16x8xbf16>,
    } else {
    }
    %c0_i32_1 = arith.constant 0 : i32
    %4 = arith.cmpi ne, %arg1, %c0_i32_1 : i32
    %5 = arith.extui %4 : i1 to i32
    %c0_i32_2 = arith.constant 0 : i32
    %6 = arith.cmpi ne, %5, %c0_i32_2 : i32
    scf.if %6 {
      %c0_21 = arith.constant 0 : index
      %c0_22 = arith.constant 0 : index
      %c0_23 = arith.constant 0 : index
      %41 = vector.load %arg3[%c0_21, %c0_22, %c0_23] : memref<1x16x8xf32, #tpu.memory_space<vmem>>, vector<1x16x8xf32>
      %42 = vector.shape_cast %41 : vector<1x16x8xf32> to vector<16x8xf32>
      %43 = arith.truncf %42 : vector<16x8xf32> to vector<16x8xbf16>
      %c0_24 = arith.constant 0 : index
      %c0_25 = arith.constant 0 : index
      %44 = vector.load %arg8[%c0_24, %c0_25] : memref<48x8xbf16, #tpu.memory_space<vmem>>, vector<16x8xbf16>
      tpu.vector_store %arg8[%c0_24, %c0_25], %43 {strides = array<i32>} : memref<48x8xbf16, #tpu.memory_space<vmem>>, vector<16x8xbf16>,
    } else {
    }
    %c16_i32_3 = arith.constant 16 : i32
    %7 = arith.addi %0, %c16_i32_3 : i32
    %c16_i32_4 = arith.constant 16 : i32
    %8 = arith.cmpi sgt, %7, %c16_i32_4 : i32
    %9 = arith.extui %8 : i1 to i32
    %c0_i32_5 = arith.constant 0 : i32
    %10 = arith.cmpi ne, %9, %c0_i32_5 : i32
    scf.if %10 {
      %41 = tpu.iota {dimensions = array<i32: 0>} : vector<16x1xi32>
      %42 = vector.broadcast %0 : i32 to vector<16x1xi32>
      %43 = arith.addi %42, %41 : vector<16x1xi32>
      %c0_21 = arith.constant 0 : index
      %c0_22 = arith.constant 0 : index
      %c0_23 = arith.constant 0 : index
      %44 = vector.load %arg2[%c0_21, %c0_22, %c0_23] : memref<1x16x8xf32, #tpu.memory_space<vmem>>, vector<1x16x8xf32>
      %45 = vector.shape_cast %44 : vector<1x16x8xf32> to vector<16x8xf32>
      %c16_i32_24 = arith.constant 16 : i32
      %46 = vector.broadcast %c16_i32_24 : i32 to vector<16x1xi32>
      %47 = arith.cmpi slt, %43, %46 : vector<16x1xi32>
      %cst_25 = arith.constant 0.000000e+00 : f32
      %48 = vector.broadcast %cst_25 : f32 to vector<16x8xf32>
      %49 = vector.shape_cast %47 : vector<16x1xi1> to vector<16x1xi1>
      %50 = vector.broadcast %49 : vector<16x1xi1> to vector<16x8xi1>
      %51 = arith.select %50, %45, %48 : vector<16x8xi1>, vector<16x8xf32>
      %52 = arith.truncf %51 : vector<16x8xf32> to vector<16x8xbf16>
      %c16 = arith.constant 16 : index
      %c0_26 = arith.constant 0 : index
      %53 = vector.load %arg8[%c16, %c0_26] : memref<48x8xbf16, #tpu.memory_space<vmem>>, vector<16x8xbf16>
      tpu.vector_store %arg8[%c16, %c0_26], %52 {strides = array<i32>} : memref<48x8xbf16, #tpu.memory_space<vmem>>, vector<16x8xbf16>,
    } else {
    }
    %true = arith.constant true
    %11 = arith.xori %8, %true : i1
    %12 = arith.extui %11 : i1 to i32
    %c0_i32_6 = arith.constant 0 : i32
    %13 = arith.cmpi ne, %12, %c0_i32_6 : i32
    scf.if %13 {
      %c0_21 = arith.constant 0 : index
      %c0_22 = arith.constant 0 : index
      %c0_23 = arith.constant 0 : index
      %41 = vector.load %arg2[%c0_21, %c0_22, %c0_23] : memref<1x16x8xf32, #tpu.memory_space<vmem>>, vector<1x16x8xf32>
      %42 = vector.shape_cast %41 : vector<1x16x8xf32> to vector<16x8xf32>
      %43 = arith.truncf %42 : vector<16x8xf32> to vector<16x8xbf16>
      %c16 = arith.constant 16 : index
      %c0_24 = arith.constant 0 : index
      %44 = vector.load %arg8[%c16, %c0_24] : memref<48x8xbf16, #tpu.memory_space<vmem>>, vector<16x8xbf16>
      tpu.vector_store %arg8[%c16, %c0_24], %43 {strides = array<i32>} : memref<48x8xbf16, #tpu.memory_space<vmem>>, vector<16x8xbf16>,
    } else {
    }
    %c16_i32_7 = arith.constant 16 : i32
    %14 = arith.addi %0, %c16_i32_7 : i32
    %c16_i32_8 = arith.constant 16 : i32
    %15 = arith.addi %14, %c16_i32_8 : i32
    %c16_i32_9 = arith.constant 16 : i32
    %16 = arith.cmpi sgt, %15, %c16_i32_9 : i32
    %17 = arith.extui %16 : i1 to i32
    %c0_i32_10 = arith.constant 0 : i32
    %18 = arith.cmpi ne, %17, %c0_i32_10 : i32
    scf.if %18 {
      %41 = tpu.iota {dimensions = array<i32: 0>} : vector<16x1xi32>
      %42 = vector.broadcast %14 : i32 to vector<16x1xi32>
      %43 = arith.addi %42, %41 : vector<16x1xi32>
      %c0_21 = arith.constant 0 : index
      %c0_22 = arith.constant 0 : index
      %c0_23 = arith.constant 0 : index
      %44 = vector.load %arg4[%c0_21, %c0_22, %c0_23] : memref<1x16x8xf32, #tpu.memory_space<vmem>>, vector<1x16x8xf32>
      %45 = vector.shape_cast %44 : vector<1x16x8xf32> to vector<16x8xf32>
      %c16_i32_24 = arith.constant 16 : i32
      %46 = vector.broadcast %c16_i32_24 : i32 to vector<16x1xi32>
      %47 = arith.cmpi slt, %43, %46 : vector<16x1xi32>
      %cst_25 = arith.constant 0.000000e+00 : f32
      %48 = vector.broadcast %cst_25 : f32 to vector<16x8xf32>
      %49 = vector.shape_cast %47 : vector<16x1xi1> to vector<16x1xi1>
      %50 = vector.broadcast %49 : vector<16x1xi1> to vector<16x8xi1>
      %51 = arith.select %50, %45, %48 : vector<16x8xi1>, vector<16x8xf32>
      %52 = arith.truncf %51 : vector<16x8xf32> to vector<16x8xbf16>
      %c32 = arith.constant 32 : index
      %c0_26 = arith.constant 0 : index
      %53 = vector.load %arg8[%c32, %c0_26] : memref<48x8xbf16, #tpu.memory_space<vmem>>, vector<16x8xbf16>
      tpu.vector_store %arg8[%c32, %c0_26], %52 {strides = array<i32>} : memref<48x8xbf16, #tpu.memory_space<vmem>>, vector<16x8xbf16>,
    } else {
    }
    %true_11 = arith.constant true
    %19 = arith.xori %16, %true_11 : i1
    %20 = arith.extui %19 : i1 to i32
    %c0_i32_12 = arith.constant 0 : i32
    %21 = arith.cmpi ne, %20, %c0_i32_12 : i32
    scf.if %21 {
      %c0_21 = arith.constant 0 : index
      %c0_22 = arith.constant 0 : index
      %c0_23 = arith.constant 0 : index
      %41 = vector.load %arg4[%c0_21, %c0_22, %c0_23] : memref<1x16x8xf32, #tpu.memory_space<vmem>>, vector<1x16x8xf32>
      %42 = vector.shape_cast %41 : vector<1x16x8xf32> to vector<16x8xf32>
      %43 = arith.truncf %42 : vector<16x8xf32> to vector<16x8xbf16>
      %c32 = arith.constant 32 : index
      %c0_24 = arith.constant 0 : index
      %44 = vector.load %arg8[%c32, %c0_24] : memref<48x8xbf16, #tpu.memory_space<vmem>>, vector<16x8xbf16>
      tpu.vector_store %arg8[%c32, %c0_24], %43 {strides = array<i32>} : memref<48x8xbf16, #tpu.memory_space<vmem>>, vector<16x8xbf16>,
    } else {
    }
    %c0 = arith.constant 0 : index
    %c0_13 = arith.constant 0 : index
    %22 = vector.load %arg6[%c0, %c0_13] : memref<1x16xf32, #tpu.memory_space<vmem>>, vector<1x16xf32>
    %23 = vector.shape_cast %22 : vector<1x16xf32> to vector<1x16xf32>
    %24 = vector.broadcast %23 : vector<1x16xf32> to vector<16x16xf32>
    %c0_14 = arith.constant 0 : index
    %c0_15 = arith.constant 0 : index
    %25 = vector.load %arg8[%c0_14, %c0_15] : memref<48x8xbf16, #tpu.memory_space<vmem>>, vector<48x8xbf16>
    %c0_16 = arith.constant 0 : index
    %c0_17 = arith.constant 0 : index
    %26 = vector.load %arg5[%c0_16, %c0_17] : memref<8x640xbf16, #tpu.memory_space<vmem>>, vector<8x640xbf16>
    %cst = arith.constant dense<0.000000e+00> : vector<48x640xf32>
    %27 = tpu.matmul %25, %26, %cst {dimension_numbers = #tpu.dot_dimension_numbers<[1], [0], [0], [1], [0, 0, 1, 1], [], []>} : vector<48x8xbf16>, vector<8x640xbf16>, vector<48x640xf32> -> vector<48x640xf32>
    %28 = vector.extract_strided_slice %27 {offsets = [12, 0], sizes = [16, 16], strides = [1, 1]} : vector<48x640xf32> to vector<16x16xf32>
    %29 = arith.addf %24, %28 : vector<16x16xf32>
    %30 = vector.extract_strided_slice %27 {offsets = [14, 128], sizes = [16, 16], strides = [1, 1]} : vector<48x640xf32> to vector<16x16xf32>
    %31 = arith.addf %29, %30 : vector<16x16xf32>
    %32 = vector.extract_strided_slice %27 {offsets = [16, 256], sizes = [16, 16], strides = [1, 1]} : vector<48x640xf32> to vector<16x16xf32>
    %33 = arith.addf %31, %32 : vector<16x16xf32>
    %34 = vector.extract_strided_slice %27 {offsets = [18, 384], sizes = [16, 16], strides = [1, 1]} : vector<48x640xf32> to vector<16x16xf32>
    %35 = arith.addf %33, %34 : vector<16x16xf32>
    %36 = vector.extract_strided_slice %27 {offsets = [20, 512], sizes = [16, 16], strides = [1, 1]} : vector<48x640xf32> to vector<16x16xf32>
    %37 = arith.addf %35, %36 : vector<16x16xf32>
    %c0_18 = arith.constant 0 : index
    %c0_19 = arith.constant 0 : index
    %c0_20 = arith.constant 0 : index
    %38 = vector.load %arg7[%c0_18, %c0_19, %c0_20] : memref<1x16x16xf32, #tpu.memory_space<vmem>>, vector<1x16x16xf32>
    %39 = vector.shape_cast %38 : vector<1x16x16xf32> to vector<16x16xf32>
    %40 = vector.shape_cast %37 : vector<16x16xf32> to vector<1x16x16xf32>
    tpu.vector_store %arg7[%c0_18, %c0_19, %c0_20], %40 {strides = array<i32>} : memref<1x16x16xf32, #tpu.memory_space<vmem>>, vector<1x16x16xf32>,
    return
  }
  func.func @transform_0(%arg0: i32, %arg1: i32) -> (i32, i32, i32) {
    %c0_i32 = arith.constant 0 : i32
    %c0_i32_0 = arith.constant 0 : i32
    return %arg0, %arg1, %c0_i32 : i32, i32, i32
  }
  func.func @transform_1(%arg0: i32, %arg1: i32) -> (i32, i32, i32) {
    %c1_i32 = arith.constant 1 : i32
    %0 = arith.muli %arg1, %c1_i32 : i32
    %c1_i32_0 = arith.constant 1 : i32
    %1 = arith.subi %0, %c1_i32_0 : i32
    %c0_i32 = arith.constant 0 : i32
    %2 = arith.maxsi %1, %c0_i32 : i32
    %c0_i32_1 = arith.constant 0 : i32
    %c0_i32_2 = arith.constant 0 : i32
    return %arg0, %2, %c0_i32_1 : i32, i32, i32
  }
  func.func @transform_2(%arg0: i32, %arg1: i32) -> (i32, i32, i32) {
    %c1_i32 = arith.constant 1 : i32
    %0 = arith.addi %arg1, %c1_i32 : i32
    %c1_i32_0 = arith.constant 1 : i32
    %1 = arith.muli %0, %c1_i32_0 : i32
    %c0_i32 = arith.constant 0 : i32
    %2 = arith.minsi %1, %c0_i32 : i32
    %c0_i32_1 = arith.constant 0 : i32
    %c0_i32_2 = arith.constant 0 : i32
    return %arg0, %2, %c0_i32_1 : i32, i32, i32
  }
  func.func @transform_3(%arg0: i32, %arg1: i32) -> (i32, i32) {
    %c0_i32 = arith.constant 0 : i32
    %c0_i32_0 = arith.constant 0 : i32
    %c0_i32_1 = arith.constant 0 : i32
    return %c0_i32, %c0_i32_0 : i32, i32
  }
  func.func @transform_4(%arg0: i32, %arg1: i32) -> (i32, i32) {
    %c0_i32 = arith.constant 0 : i32
    %c0_i32_0 = arith.constant 0 : i32
    %c0_i32_1 = arith.constant 0 : i32
    return %c0_i32, %c0_i32_0 : i32, i32
  }
  func.func @transform_5(%arg0: i32, %arg1: i32) -> (i32, i32, i32) {
    %c0_i32 = arith.constant 0 : i32
    %c0_i32_0 = arith.constant 0 : i32
    return %arg0, %arg1, %c0_i32 : i32, i32, i32
  }
}

</mosaic_0001>

<bundles_post_ra>
// kernel: tpu_custom_call.1
= control target key start
LH: loop header
LB: loop body
LE: loop exit
PB: predicated region body
PF: predicated region fallthrough
CT: control target
= control target key end

     0   :  { %10 = vsyncpa [#allocation4], 0  ;;  %s1188_s0 = inlined_call_operand.vmem [shape: f32[2,16,8], index: 0, kind: input, shape index: {}]   ;;  %s1189_s1 = inlined_call_operand.vmem [shape: f32[2,16,8], index: 1, kind: input, shape index: {}]   ;;  %s1190_s2 = inlined_call_operand.vmem [shape: f32[2,16,8], index: 2, kind: input, shape index: {}]   ;;  %s1191_s3 = inlined_call_operand.vmem [shape: bf16[8,640], index: 3, kind: input, shape index: {}]   ;;  %s1192_s4 = inlined_call_operand.vmem [shape: f32[1,16], index: 4, kind: input, shape index: {}]   ;;  %s1193_s5 = inlined_call_operand.hbm [shape: f32[2,16,16], index: 5, kind: output, shape index: {}]  }
   0x1   :  { %12 = vsyncpa [#allocation4 + $0x1], 0  ;;  %s1046_s18 = smov 0   ;;  %s1048_s19 = smov 0  }
   0x2   :  { %s1050_s20 = smov 0   ;;  %s1052_s1 = smov 0  }
   0x3   :  { %s1054_s2 = smov 0   ;;  %s1056_s21 = smov 0  }
   0x4 LB: > { %s819_s22 = sadd.s32 4294967295, %s1010_s21   ;;  %s820_s23 = sadd.s32 4294967294, %s1010_s21   ;;  %s1010_s21 = sphi %s1056_s21, %s18_s21   ;;  %s1006_s2 = sphi %s1054_s2, %s1200_s2   ;;  %s1002_s1 = sphi %s1052_s1, %s1199_s1   ;;  %s998_s20 = sphi %s1050_s20, %s1198_s20   ;;  %s994_s19 = sphi %s1048_s19, %s1197_s19   ;;  %s990_s18 = sphi %s1046_s18, %s1196_s18  }
   0x5   : > { %s30_s24 = sadd.s32 1, %s1006_s2  ;;  %s177_s25 = sadd.s32 1, %s998_s20 }
   0x6   : > { %p32_p0 = scmp.ge.s32.totalorder %s30_s24, 2  ;;  %p187_p1 = scmp.ne.s32.totalorder %s998_s20, %s994_s19 }
   0x7   : > { %p188_p2 = scmp.eq.s32.totalorder %s819_s22, 1  ;;  %p193_p3 = scmp.ne.s32.totalorder %s994_s19, %s990_s18 }
   0x8   : > { %s1202_s24 = smov (%p32_p0, %s30_s24), 0  ;;  %p194_p5 = scmp.eq.s32.totalorder %s820_s23, 1 }
   0x9   : > { %p1086_p4 = por %p188_p2, %p187_p1  ;;  %s172_s27 = ssub.s32 %s1006_s2, %s1202_s24 }
   0xa   : > { %p823_p6 = scmp.ge.s32.totalorder %s1010_s21, 1  ;;  %p175_p7 = scmp.eq.s32.totalorder %s172_s27, 0 }
   0xb   : > { %p1093_p8 = por %p194_p5, %p193_p3  ;;  %p269_p9 = scmp.lt.s32.totalorder %s1010_s21, 3 }
   0xc   : > { %s1099_s29 = scalar_select %p175_p7, %s998_s20, %s177_s25  }
   0xd   : > { %p270_p10 = pnand %p823_p6, %p269_p9 }
   0xe   : > { %p326_p11 = scmp.lt.s32.totalorder (!%p270_p10), %s1002_s1, 1  ;;  %s322_s22 = sand.u32 (!%p270_p10), 1, %s994_s19  }
   0xf   : > { %273 = sbr.rel (%p270_p10) target bundleno = 220 (0xdc), region = 40  ;;  %s824_s23 = sshll.u32 (!%p270_p10), %s322_s22, 4 }
  0x10   : > { %s869_s25 = sshll.u32 (!%p270_p10), %s1002_s1, 4  ;;  %s324_s7 = scalar_lea.vmem (!%p270_p10), [#allocation3], %s824_s23 }
  0x11   : > { %s700_s6 = scalar_lea.hbm (!%p270_p10), %s1193_s5, %s869_s25  ;;  %s687_s9 = scalar_lea.sflag (!%p270_p10), [#allocation4], %s322_s22 }
  0x12   : > { %s703_s8 = sshll.u32 (!%p270_p10), %s700_s6, 4  ;;  %s952_s14 = scalar_lea.hbm (!%p270_p10), %s1193_s5, 32  ;;  %s704_s8 = int_to_ptr.hbm [resolvable:$true] %s703_s8 }
  0x13   : > { %s946_s10 = sshra.s32 (!%p270_p10), %s704_s8, 4  ;;  %s947_s10 = int_to_ptr.hbm [resolvable:$true] %s946_s10 }
  0x14   : > { %v472_v0 = vld [vmem:[%s1191_s3] sm:$0xff]  ;;  %v473_v1 = vld [vmem:[%s1191_s3 + $0x8] sm:$0xff]  ;;  %vm374_vm0 = vcmask 60416   ;;  %v1012_v4 = vmov 0   ;;  %v474_v6 = vld [vmem:[%s1191_s3 + $0x10] sm:$0xf]  ;;  %p953_p1 = scmp.lt.s32.totalorder %s947_s10, %s1193_s5 }
  0x15   : > { %v493_v2 = vunpack.c.l.b16 %v472_v0  ;;  %v496_v3 = vunpack.c.h.b16 %v473_v1  ;;  %375 = vst.msk [vmem:[#allocation2] sm:$0xf] %vm374_vm0, %v1012_v4  ;;  %v495_v5 = vunpack.c.l.b16 %v473_v1  ;;  %vm513_vm1 = vcmask 1043456   ;;  %s327_s11 = scalar_select %p326_p11, %s1002_s1, 1  ;;  %v931_v45 = vld [vmem:[%s1192_s4] ss:$0 sm:$0xff] }
  0x16   : > { %376 = vst.msk [vmem:[#allocation2 + $0x4] sm:$0xf] %vm374_vm0, %v1012_v4  ;;  %v494_v7 = vunpack.c.h.b16 %v472_v0  ;;  %v497_v8 = vunpack.c.l.b16 %v474_v6  ;;  %v1013_v11 = vmov 0.0|0.0   ;;  %vm503_vm2 = vcmask 64512   ;;  %s701_s1 = sshll.u32 %s324_s7, 4  ;;  %s702_s1 = int_to_ptr.vmem [resolvable:$true] %s701_s1 }
  0x17   : > { %v498_v9 = vpack.c.b16 %v493_v2, %v493_v2  ;;  %v501_v10 = vpack.c.b16 %v496_v3, %v496_v3  ;;  %449 = vst.msk [vmem:[#allocation2 + $0x10] sm:$0xf] %vm374_vm0, %v1013_v11  ;;  %v500_v12 = vpack.c.b16 %v495_v5, %v495_v5  ;;  %s863_s12 = sshll.u32 %s327_s11, 4  ;;  %vm639_vm3 = vcmask 1045504   ;;  %s948_s11 = scalar_lea.hbm %s947_s10, 16 }
  0x18   : > { %450 = vst.msk [vmem:[#allocation2 + $0x14] sm:$0xf] %vm374_vm0, %v1013_v11  ;;  %v499_v13 = vpack.c.b16 %v494_v7, %v494_v7  ;;  %v502_v14 = vpack.c.b16 %v497_v8, %v497_v8  ;;  %s333_s15 = scalar_lea.vmem %s1188_s0, %s863_s12  ;;  %vm680_vm4 = vcmask 130052   ;;  %vm665_vm5 = vcmask 1041408   ;;  %p949_p12 = scmp.ne.s32.totalorder %s947_s10, %s948_s11 }
  0x19   : > { %v515_v15 = vsel %vm513_vm1, %v498_v9, 0  ;;  %v524_v16 = vsel %vm513_vm1, %v501_v10, 0  ;;  %v521_v17 = vsel %vm513_vm1, %v500_v12, 0  ;;  %v418_v20 = vld [vmem:[%s333_s15] sm:$0xff]  ;;  %v419_v21 = vld [vmem:[%s333_s15 + $0x8] sm:$0xff]  ;;  %vm684_vm6 = vcmask 125952   ;;  %p954_p2 = scmp.lt.s32.totalorder %s952_s14, %s948_s11 }
  0x1a   : > { %536 = vmatpush.bf16.msra.mxu0 %v515_v15  ;;  %871 = vmatpush.bf16.msra.mxu2 %v515_v15  ;;  %v518_v18 = vsel %vm513_vm1, %v499_v13, 0  ;;  %v527_v19 = vsel %vm513_vm1, %v502_v14, 0  ;;  %v420_v22 = vpack.c.bf16 %v418_v20, %v418_v20  ;;  %v421_v23 = vpack.c.bf16 %v419_v21, %v419_v21  ;;  %p950_p13 = pnand %p949_p12, %p1086_p4 }
  0x1b   : > { %598 = vmatpush.bf16.msra.mxu3 %v524_v16  ;;  %870 = vmatpush.bf16.msra.mxu1 %v515_v15  ;;  %vm682_vm7 = vcmask 130048   ;;  %p955_p3 = por %p954_p2, %p953_p1 }
  0x1c   : > { %423 = vst.msk [vmem:[#allocation2 + $0x8] sm:$0xf] %vm374_vm0, %v420_v22  ;;  %p951_p0 = pneg %p950_p13 }
  0x1d   : > { %v866_v24 = vld [vmem:[#allocation2] sm:$0xff]  ;;  %424 = vst.msk [vmem:[#allocation2 + $0xc] sm:$0xf] %vm374_vm0, %v421_v23 }
  0x1e   : > { %578 = vmatpush.bf16.msrb.mxu2 %v521_v17  ;;  %619 = vmatpush.bf16.msrb.mxu0 %v527_v19  ;;  %p956_p5 = pnand %p955_p3, %p951_p0 }
  0x1f   : > { %557 = vmatpush.bf16.msrb.mxu1 %v518_v18  ;;  %843 = vmatmul.msk.bf16.vlgmr.msra.gmra.mxu0 %vm503_vm2, %v866_v24  ;;  %v868_v25 = vld [vmem:[#allocation2 + $0x10] sm:$0xff] }
  0x20   : > { %852 = vmatmul.msk.bf16.vlgmr.msra.gmra.mxu3 %vm503_vm2, %v866_v24  ;;  %845 = vmatmul.msk.bf16.vlgmr.msra.gmra.mxu2 %vm503_vm2, %v868_v25 }
  0x24   : > { %v867_v26 = vld [vmem:[#allocation2 + $0x8] sm:$0xff] }
  0x25   : > { %844 = vmatmul.msk.bf16.vlgmr.msra.gmra.mxu1 %vm503_vm2, %v867_v26 }
  0x2f   : > { %855 = vmatmul.msk.bf16.vlgmr.msrb.gmra.mxu0 %vm503_vm2, %v866_v24 }
  0x30   : > { %853 = vmatmul.msk.bf16.gmra.mxu3 %vm503_vm2, %v867_v26  ;;  %849 = vmatmul.msk.bf16.vlgmr.msrb.gmra.mxu2 %vm503_vm2, %v866_v24 }
  0x35   : > { %846 = vmatmul.msk.bf16.vlgmr.msrb.gmra.mxu1 %vm503_vm2, %v866_v24 }
  0x3f   : > { %856 = vmatmul.msk.bf16.gmra.mxu0 %vm503_vm2, %v867_v26 }
  0x40   : > { %854 = vmatmul.msk.bf16.gmra.mxu3 %vm503_vm2, %v868_v25  ;;  %850 = vmatmul.msk.bf16.gmra.mxu2 %vm503_vm2, %v867_v26 }
  0x45   : > { %847 = vmatmul.msk.bf16.gmra.mxu1 %vm503_vm2, %v867_v26 }
  0x4f   : > { %857 = vmatmul.msk.bf16.gmra.mxu0 %vm503_vm2, %v868_v25 }
  0x50   : > { %851 = vmatmul.msk.bf16.gmra.mxu2 %vm503_vm2, %v868_v25 }
  0x55   : > { %848 = vmatmul.msk.bf16.gmra.mxu1 %vm503_vm2, %v868_v25 }
  0x9c   : > { %v538_v27 = vpop.f32.mrf.mxu0 }
  0xa2   : > { %v542_v31 = vpop.f32.mrf.mxu1 }
  0xa3   : > { %v600_v28 = vpop.f32.mrf.mxu3  ;;  %v547_v29 = vpop.f32.mrf.mxu2  ;;  %v634_v1 = vadd.f32 %v931_v45, %v542_v31 }
  0xa4   : > { %v539_v30 = vpop.f32.mrf.mxu0 }
  0xa5   : > { %v633_v51 = vadd.f32 %v931_v45, %v539_v30 }
  0xaa   : > { %v544_v35 = vpop.f32.mrf.mxu1 }
  0xab   : > { %v601_v32 = vpop.f32.mrf.mxu3  ;;  %v548_v33 = vpop.f32.mrf.mxu2  ;;  %v635_v62 = vadd.f32 %v931_v45, %v544_v35 }
  0xac   : > { %v621_v34 = vpop.f32.mrf.mxu0 }
  0xb2   : > { %v559_v39 = vpop.f32.mrf.mxu1 }
  0xb3   : > { %v603_v36 = vpop.f32.mrf.mxu3  ;;  %v580_v37 = vpop.f32.mrf.mxu2 }
  0xb4   : > { %v622_v38 = vpop.f32.mrf.mxu0  ;;  %v666_v56 = vrot.slane %v603_v36, 6 }
  0xba   : > { %v560_v43 = vpop.f32.mrf.mxu1 }
  0xbb   : > { %v605_v40 = vpop.f32.mrf.mxu3  ;;  %v581_v41 = vpop.f32.mrf.mxu2  ;;  %v640_v49 = vrot.slane %v560_v43, 2 }
  0xbc   : > { %v624_v42 = vpop.f32.mrf.mxu0  ;;  %v667_v2 = vrot.slane %v605_v40, 6 }
  0xbe   : > { %v668_v12 = vsel %vm665_vm5, %v666_v56, %v667_v2 }
  0xc2   : > { %v563_v48 = vpop.f32.mrf.mxu1 }
  0xc3   : > { %v608_v44 = vpop.f32.mrf.mxu3  ;;  %v583_v46 = vpop.f32.mrf.mxu2  ;;  %v641_v50 = vrot.slane %v563_v48, 2 }
  0xc4   : > { %v626_v47 = vpop.f32.mrf.mxu0  ;;  %v653_v53 = vrot.slane %v583_v46, 4  ;;  %v669_v3 = vrot.slane %v608_v44, 6 }
  0xc5   : > { %v642_v52 = vsel %vm639_vm3, %v640_v49, %v641_v50 }
  0xc6   : > { %v648_v54 = vadd.f32 %v642_v52, %v633_v51  ;;  %v670_v11 = vsel %vm665_vm5, %v667_v2, %v669_v3 }
  0xc8   : > { %v659_v57 = vadd.f32 %v653_v53, %v648_v54 }
  0xca   : > { %v674_v60 = vadd.f32 %v666_v56, %v659_v57  ;;  %v565_v61 = vpop.f32.mrf.mxu1 }
  0xcb   : > { %v610_v55 = vpop.f32.mrf.mxu3  ;;  %v585_v58 = vpop.f32.mrf.mxu2  ;;  %v643_v0 = vrot.slane %v565_v61, 2 }
  0xcc   : > { %v629_v59 = vpop.f32.mrf.mxu0  ;;  %v654_v63 = vrot.slane %v585_v58, 4  ;;  %v677_v4 = vadd.f32 %v674_v60, %v624_v42 }
  0xcd   : > { %v644_v5 = vsel %vm639_vm3, %v641_v50, %v643_v0  ;;  %v650_v6 = vadd.f32 %v643_v0, %v635_v62 }
  0xce   : > { %v649_v7 = vadd.f32 %v644_v5, %v634_v1  ;;  %681 = vst.msk [vmem:[%s324_s7 - $0x4] sm:$0xf0] %vm680_vm4, %v677_v4  ;;  %v655_v8 = vsel %vm513_vm1, %v653_v53, %v654_v63 }
  0xcf   : > { %v661_v9 = vadd.f32 %v654_v63, %v650_v6 }
  0xd0   : > { %v660_v10 = vadd.f32 %v655_v8, %v649_v7 }
  0xd1   : > { %v676_v13 = vadd.f32 %v670_v11, %v661_v9 }
  0xd2   : > { %v675_v16 = vadd.f32 %v668_v12, %v660_v10  ;;  %v568_v17 = vpop.f32.mrf.mxu1 }
  0xd3   : > { %v588_v14 = vpop.f32.mrf.mxu2  ;;  %v679_v18 = vadd.f32 %v676_v13, %v629_v59 }
  0xd4   : > { %v631_v15 = vpop.f32.mrf.mxu0  ;;  %v678_v19 = vadd.f32 %v675_v16, %v626_v47 }
  0xd5   : > { %685 = vst.msk [vmem:[%s324_s7 + $0xc] sm:$0xf] %vm684_vm6, %v679_v18 }
  0xd6   : > { %683 = vst.msk [vmem:[%s324_s7 + $0x4] sm:$0xff] %vm682_vm7, %v678_v19 }
  0xd7   : > { %959 = shalt.err (!%p956_p5)
}
  0xd8   : > { %s1014_s17 = smov 128   ;;  %s1015_s22 = smov 8  }
  0xd9   : > { %872 = dma.vmem_to_hbm [thread:$0]  (%p1086_p4), %s702_s1, 256, %s704_s8, %s687_s9, %s1014_s17, %s1014_s17, %s1015_s22  }
  0xda   : > { %v569_v21 = vpop.f32.mrf.mxu1 }
  0xdb   : > { %v589_v20 = vpop.f32.mrf.mxu2 }
  0xdc PF: > { %p878_p6 = scmp.ge.s32.totalorder %s1010_s21, 2  ;;  %s718_s23 = sand.u32 1, %s990_s18  }
  0xdd   : > { %s719_s25 = scalar_lea.sflag [#allocation4], %s718_s23 }
  0xde   : > { %p875_p7 = pnand %p878_p6, %p1093_p8 }
  0xe0   : > { %p876_p9 = pneg %p875_p7 }
  0xe2   : > { %985 = dma.done.wait (%p876_p9), %s719_s25, 256  }
  0xe3   : > { %987 = vsyncadd (%p876_p9), %s719_s25, 4294967040  ;;  %s18_s21 = sadd.s32 1, %s1010_s21   ;;  %s1196_s18 = smov %s994_s19 }
  0xe4   : > { %p15_p10 = scmp.ge.s32.totalorder %s18_s21, 4   ;;  %s1197_s19 = smov %s998_s20 }
  0xe5   : > { %s1198_s20 = smov %s1099_s29  ;;  %s1199_s1 = smov %s1006_s2 }
  0xe6   : > { %s1200_s2 = smov %s1202_s24  ;;  %17 = sbr.rel (!%p15_p10) target bundleno = 4 (0x4), region = 105 }
  0xeb   :  { %725 = vsyncpa [#allocation4], 1 }
  0xec   :  { %727 = vsyncpa [#allocation4 + $0x1], 1 }

// kernel: tpu_custom_call.1
= control target key start
LH: loop header
LB: loop body
LE: loop exit
PB: predicated region body
PF: predicated region fallthrough
CT: control target
= control target key end

     0   :  { %10 = vsyncpa [#allocation4], 0  ;;  %s1188_s0 = inlined_call_operand.vmem [shape: f32[2,16,8], index: 0, kind: input, shape index: {}]   ;;  %s1189_s1 = inlined_call_operand.vmem [shape: f32[2,16,8], index: 1, kind: input, shape index: {}]   ;;  %s1190_s2 = inlined_call_operand.vmem [shape: f32[2,16,8], index: 2, kind: input, shape index: {}]   ;;  %s1191_s3 = inlined_call_operand.vmem [shape: bf16[8,640], index: 3, kind: input, shape index: {}]   ;;  %s1192_s4 = inlined_call_operand.vmem [shape: f32[1,16], index: 4, kind: input, shape index: {}]   ;;  %s1193_s5 = inlined_call_operand.hbm [shape: f32[2,16,16], index: 5, kind: output, shape index: {}]  }
   0x1   :  { %12 = vsyncpa [#allocation4 + $0x1], 0  ;;  %s1046_s18 = smov 0   ;;  %s1048_s19 = smov 0  }
   0x2   :  { %s1050_s20 = smov 0   ;;  %s1052_s1 = smov 0  }
   0x3   :  { %s1054_s2 = smov 0   ;;  %s1056_s21 = smov 0  }
   0x4 LB: > { %s819_s22 = sadd.s32 4294967295, %s1010_s21   ;;  %s820_s23 = sadd.s32 4294967294, %s1010_s21   ;;  %s1010_s21 = sphi %s1056_s21, %s18_s21   ;;  %s1006_s2 = sphi %s1054_s2, %s1200_s2   ;;  %s1002_s1 = sphi %s1052_s1, %s1199_s1   ;;  %s998_s20 = sphi %s1050_s20, %s1198_s20   ;;  %s994_s19 = sphi %s1048_s19, %s1197_s19   ;;  %s990_s18 = sphi %s1046_s18, %s1196_s18  }
   0x5   : > { %s30_s24 = sadd.s32 1, %s1006_s2  ;;  %s177_s25 = sadd.s32 1, %s998_s20 }
   0x6   : > { %p32_p0 = scmp.ge.s32.totalorder %s30_s24, 2  ;;  %p187_p1 = scmp.ne.s32.totalorder %s998_s20, %s994_s19 }
   0x7   : > { %p188_p2 = scmp.eq.s32.totalorder %s819_s22, 1  ;;  %p193_p3 = scmp.ne.s32.totalorder %s994_s19, %s990_s18 }
   0x8   : > { %s1202_s24 = smov (%p32_p0, %s30_s24), 0  ;;  %p194_p5 = scmp.eq.s32.totalorder %s820_s23, 1 }
   0x9   : > { %p1086_p4 = por %p188_p2, %p187_p1  ;;  %s172_s27 = ssub.s32 %s1006_s2, %s1202_s24 }
   0xa   : > { %p823_p6 = scmp.ge.s32.totalorder %s1010_s21, 1  ;;  %p175_p7 = scmp.eq.s32.totalorder %s172_s27, 0 }
   0xb   : > { %p1093_p8 = por %p194_p5, %p193_p3  ;;  %p269_p9 = scmp.lt.s32.totalorder %s1010_s21, 3 }
   0xc   : > { %s1099_s29 = scalar_select %p175_p7, %s998_s20, %s177_s25  }
   0xd   : > { %p270_p10 = pnand %p823_p6, %p269_p9 }
   0xe   : > { %p326_p11 = scmp.lt.s32.totalorder (!%p270_p10), %s1002_s1, 1  ;;  %s322_s22 = sand.u32 (!%p270_p10), 1, %s994_s19  }
   0xf   : > { %273 = sbr.rel (%p270_p10) target bundleno = 220 (0xdc), region = 40  ;;  %s824_s23 = sshll.u32 (!%p270_p10), %s322_s22, 4 }
  0x10   : > { %s869_s25 = sshll.u32 (!%p270_p10), %s1002_s1, 4  ;;  %s324_s7 = scalar_lea.vmem (!%p270_p10), [#allocation3], %s824_s23 }
  0x11   : > { %s700_s6 = scalar_lea.hbm (!%p270_p10), %s1193_s5, %s869_s25  ;;  %s687_s9 = scalar_lea.sflag (!%p270_p10), [#allocation4], %s322_s22 }
  0x12   : > { %s703_s8 = sshll.u32 (!%p270_p10), %s700_s6, 4  ;;  %s952_s14 = scalar_lea.hbm (!%p270_p10), %s1193_s5, 32  ;;  %s704_s8 = int_to_ptr.hbm [resolvable:$true] %s703_s8 }
  0x13   : > { %s946_s10 = sshra.s32 (!%p270_p10), %s704_s8, 4  ;;  %s947_s10 = int_to_ptr.hbm [resolvable:$true] %s946_s10 }
  0x14   : > { %v472_v0 = vld [vmem:[%s1191_s3] sm:$0xff]  ;;  %v473_v1 = vld [vmem:[%s1191_s3 + $0x8] sm:$0xff]  ;;  %vm374_vm0 = vcmask 60416   ;;  %v1012_v4 = vmov 0   ;;  %v474_v6 = vld [vmem:[%s1191_s3 + $0x10] sm:$0xf]  ;;  %p953_p1 = scmp.lt.s32.totalorder %s947_s10, %s1193_s5 }
  0x15   : > { %v493_v2 = vunpack.c.l.b16 %v472_v0  ;;  %v496_v3 = vunpack.c.h.b16 %v473_v1  ;;  %375 = vst.msk [vmem:[#allocation2] sm:$0xf] %vm374_vm0, %v1012_v4  ;;  %v495_v5 = vunpack.c.l.b16 %v473_v1  ;;  %vm513_vm1 = vcmask 1043456   ;;  %s327_s11 = scalar_select %p326_p11, %s1002_s1, 1  ;;  %v931_v45 = vld [vmem:[%s1192_s4] ss:$0 sm:$0xff] }
  0x16   : > { %376 = vst.msk [vmem:[#allocation2 + $0x4] sm:$0xf] %vm374_vm0, %v1012_v4  ;;  %v494_v7 = vunpack.c.h.b16 %v472_v0  ;;  %v497_v8 = vunpack.c.l.b16 %v474_v6  ;;  %v1013_v11 = vmov 0.0|0.0   ;;  %vm503_vm2 = vcmask 64512   ;;  %s701_s1 = sshll.u32 %s324_s7, 4  ;;  %s702_s1 = int_to_ptr.vmem [resolvable:$true] %s701_s1 }
  0x17   : > { %v498_v9 = vpack.c.b16 %v493_v2, %v493_v2  ;;  %v501_v10 = vpack.c.b16 %v496_v3, %v496_v3  ;;  %449 = vst.msk [vmem:[#allocation2 + $0x10] sm:$0xf] %vm374_vm0, %v1013_v11  ;;  %v500_v12 = vpack.c.b16 %v495_v5, %v495_v5  ;;  %s863_s12 = sshll.u32 %s327_s11, 4  ;;  %vm639_vm3 = vcmask 1045504   ;;  %s948_s11 = scalar_lea.hbm %s947_s10, 16 }
  0x18   : > { %450 = vst.msk [vmem:[#allocation2 + $0x14] sm:$0xf] %vm374_vm0, %v1013_v11  ;;  %v499_v13 = vpack.c.b16 %v494_v7, %v494_v7  ;;  %v502_v14 = vpack.c.b16 %v497_v8, %v497_v8  ;;  %s333_s15 = scalar_lea.vmem %s1188_s0, %s863_s12  ;;  %vm680_vm4 = vcmask 130052   ;;  %vm665_vm5 = vcmask 1041408   ;;  %p949_p12 = scmp.ne.s32.totalorder %s947_s10, %s948_s11 }
  0x19   : > { %v515_v15 = vsel %vm513_vm1, %v498_v9, 0  ;;  %v524_v16 = vsel %vm513_vm1, %v501_v10, 0  ;;  %v521_v17 = vsel %vm513_vm1, %v500_v12, 0  ;;  %v418_v20 = vld [vmem:[%s333_s15] sm:$0xff]  ;;  %v419_v21 = vld [vmem:[%s333_s15 + $0x8] sm:$0xff]  ;;  %vm684_vm6 = vcmask 125952   ;;  %p954_p2 = scmp.lt.s32.totalorder %s952_s14, %s948_s11 }
  0x1a   : > { %536 = vmatpush.bf16.msra.mxu0 %v515_v15  ;;  %871 = vmatpush.bf16.msra.mxu2 %v515_v15  ;;  %v518_v18 = vsel %vm513_vm1, %v499_v13, 0  ;;  %v527_v19 = vsel %vm513_vm1, %v502_v14, 0  ;;  %v420_v22 = vpack.c.bf16 %v418_v20, %v418_v20  ;;  %v421_v23 = vpack.c.bf16 %v419_v21, %v419_v21  ;;  %p950_p13 = pnand %p949_p12, %p1086_p4 }
  0x1b   : > { %598 = vmatpush.bf16.msra.mxu3 %v524_v16  ;;  %870 = vmatpush.bf16.msra.mxu1 %v515_v15  ;;  %vm682_vm7 = vcmask 130048   ;;  %p955_p3 = por %p954_p2, %p953_p1 }
  0x1c   : > { %423 = vst.msk [vmem:[#allocation2 + $0x8] sm:$0xf] %vm374_vm0, %v420_v22  ;;  %p951_p0 = pneg %p950_p13 }
  0x1d   : > { %v866_v24 = vld [vmem:[#allocation2] sm:$0xff]  ;;  %424 = vst.msk [vmem:[#allocation2 + $0xc] sm:$0xf] %vm374_vm0, %v421_v23 }
  0x1e   : > { %578 = vmatpush.bf16.msrb.mxu2 %v521_v17  ;;  %619 = vmatpush.bf16.msrb.mxu0 %v527_v19  ;;  %p956_p5 = pnand %p955_p3, %p951_p0 }
  0x1f   : > { %557 = vmatpush.bf16.msrb.mxu1 %v518_v18  ;;  %843 = vmatmul.msk.bf16.vlgmr.msra.gmra.mxu0 %vm503_vm2, %v866_v24  ;;  %v868_v25 = vld [vmem:[#allocation2 + $0x10] sm:$0xff] }
  0x20   : > { %852 = vmatmul.msk.bf16.vlgmr.msra.gmra.mxu3 %vm503_vm2, %v866_v24  ;;  %845 = vmatmul.msk.bf16.vlgmr.msra.gmra.mxu2 %vm503_vm2, %v868_v25 }
  0x24   : > { %v867_v26 = vld [vmem:[#allocation2 + $0x8] sm:$0xff] }
  0x25   : > { %844 = vmatmul.msk.bf16.vlgmr.msra.gmra.mxu1 %vm503_vm2, %v867_v26 }
  0x2f   : > { %855 = vmatmul.msk.bf16.vlgmr.msrb.gmra.mxu0 %vm503_vm2, %v866_v24 }
  0x30   : > { %853 = vmatmul.msk.bf16.gmra.mxu3 %vm503_vm2, %v867_v26  ;;  %849 = vmatmul.msk.bf16.vlgmr.msrb.gmra.mxu2 %vm503_vm2, %v866_v24 }
  0x35   : > { %846 = vmatmul.msk.bf16.vlgmr.msrb.gmra.mxu1 %vm503_vm2, %v866_v24 }
  0x3f   : > { %856 = vmatmul.msk.bf16.gmra.mxu0 %vm503_vm2, %v867_v26 }
  0x40   : > { %854 = vmatmul.msk.bf16.gmra.mxu3 %vm503_vm2, %v868_v25  ;;  %850 = vmatmul.msk.bf16.gmra.mxu2 %vm503_vm2, %v867_v26 }
  0x45   : > { %847 = vmatmul.msk.bf16.gmra.mxu1 %vm503_vm2, %v867_v26 }
  0x4f   : > { %857 = vmatmul.msk.bf16.gmra.mxu0 %vm503_vm2, %v868_v25 }
  0x50   : > { %851 = vmatmul.msk.bf16.gmra.mxu2 %vm503_vm2, %v868_v25 }
  0x55   : > { %848 = vmatmul.msk.bf16.gmra.mxu1 %vm503_vm2, %v868_v25 }
  0x9c   : > { %v538_v27 = vpop.f32.mrf.mxu0 }
  0xa2   : > { %v542_v31 = vpop.f32.mrf.mxu1 }
  0xa3   : > { %v600_v28 = vpop.f32.mrf.mxu3  ;;  %v547_v29 = vpop.f32.mrf.mxu2  ;;  %v634_v1 = vadd.f32 %v931_v45, %v542_v31 }
  0xa4   : > { %v539_v30 = vpop.f32.mrf.mxu0 }
  0xa5   : > { %v633_v51 = vadd.f32 %v931_v45, %v539_v30 }
  0xaa   : > { %v544_v35 = vpop.f32.mrf.mxu1 }
  0xab   : > { %v601_v32 = vpop.f32.mrf.mxu3  ;;  %v548_v33 = vpop.f32.mrf.mxu2  ;;  %v635_v62 = vadd.f32 %v931_v45, %v544_v35 }
  0xac   : > { %v621_v34 = vpop.f32.mrf.mxu0 }
  0xb2   : > { %v559_v39 = vpop.f32.mrf.mxu1 }
  0xb3   : > { %v603_v36 = vpop.f32.mrf.mxu3  ;;  %v580_v37 = vpop.f32.mrf.mxu2 }
  0xb4   : > { %v622_v38 = vpop.f32.mrf.mxu0  ;;  %v666_v56 = vrot.slane %v603_v36, 6 }
  0xba   : > { %v560_v43 = vpop.f32.mrf.mxu1 }
  0xbb   : > { %v605_v40 = vpop.f32.mrf.mxu3  ;;  %v581_v41 = vpop.f32.mrf.mxu2  ;;  %v640_v49 = vrot.slane %v560_v43, 2 }
  0xbc   : > { %v624_v42 = vpop.f32.mrf.mxu0  ;;  %v667_v2 = vrot.slane %v605_v40, 6 }
  0xbe   : > { %v668_v12 = vsel %vm665_vm5, %v666_v56, %v667_v2 }
  0xc2   : > { %v563_v48 = vpop.f32.mrf.mxu1 }
  0xc3   : > { %v608_v44 = vpop.f32.mrf.mxu3  ;;  %v583_v46 = vpop.f32.mrf.mxu2  ;;  %v641_v50 = vrot.slane %v563_v48, 2 }
  0xc4   : > { %v626_v47 = vpop.f32.mrf.mxu0  ;;  %v653_v53 = vrot.slane %v583_v46, 4  ;;  %v669_v3 = vrot.slane %v608_v44, 6 }
  0xc5   : > { %v642_v52 = vsel %vm639_vm3, %v640_v49, %v641_v50 }
  0xc6   : > { %v648_v54 = vadd.f32 %v642_v52, %v633_v51  ;;  %v670_v11 = vsel %vm665_vm5, %v667_v2, %v669_v3 }
  0xc8   : > { %v659_v57 = vadd.f32 %v653_v53, %v648_v54 }
  0xca   : > { %v674_v60 = vadd.f32 %v666_v56, %v659_v57  ;;  %v565_v61 = vpop.f32.mrf.mxu1 }
  0xcb   : > { %v610_v55 = vpop.f32.mrf.mxu3  ;;  %v585_v58 = vpop.f32.mrf.mxu2  ;;  %v643_v0 = vrot.slane %v565_v61, 2 }
  0xcc   : > { %v629_v59 = vpop.f32.mrf.mxu0  ;;  %v654_v63 = vrot.slane %v585_v58, 4  ;;  %v677_v4 = vadd.f32 %v674_v60, %v624_v42 }
  0xcd   : > { %v644_v5 = vsel %vm639_vm3, %v641_v50, %v643_v0  ;;  %v650_v6 = vadd.f32 %v643_v0, %v635_v62 }
  0xce   : > { %v649_v7 = vadd.f32 %v644_v5, %v634_v1  ;;  %681 = vst.msk [vmem:[%s324_s7 - $0x4] sm:$0xf0] %vm680_vm4, %v677_v4  ;;  %v655_v8 = vsel %vm513_vm1, %v653_v53, %v654_v63 }
  0xcf   : > { %v661_v9 = vadd.f32 %v654_v63, %v650_v6 }
  0xd0   : > { %v660_v10 = vadd.f32 %v655_v8, %v649_v7 }
  0xd1   : > { %v676_v13 = vadd.f32 %v670_v11, %v661_v9 }
  0xd2   : > { %v675_v16 = vadd.f32 %v668_v12, %v660_v10  ;;  %v568_v17 = vpop.f32.mrf.mxu1 }
  0xd3   : > { %v588_v14 = vpop.f32.mrf.mxu2  ;;  %v679_v18 = vadd.f32 %v676_v13, %v629_v59 }
  0xd4   : > { %v631_v15 = vpop.f32.mrf.mxu0  ;;  %v678_v19 = vadd.f32 %v675_v16, %v626_v47 }
  0xd5   : > { %685 = vst.msk [vmem:[%s324_s7 + $0xc] sm:$0xf] %vm684_vm6, %v679_v18 }
  0xd6   : > { %683 = vst.msk [vmem:[%s324_s7 + $0x4] sm:$0xff] %vm682_vm7, %v678_v19 }
  0xd7   : > { %959 = shalt.err (!%p956_p5)
}
  0xd8   : > { %s1014_s17 = smov 128   ;;  %s1015_s22 = smov 8  }
  0xd9   : > { %872 = dma.vmem_to_hbm [thread:$0]  (%p1086_p4), %s702_s1, 256, %s704_s8, %s687_s9, %s1014_s17, %s1014_s17, %s1015_s22  }
  0xda   : > { %v569_v21 = vpop.f32.mrf.mxu1 }
  0xdb   : > { %v589_v20 = vpop.f32.mrf.mxu2 }
  0xdc PF: > { %p878_p6 = scmp.ge.s32.totalorder %s1010_s21, 2  ;;  %s718_s23 = sand.u32 1, %s990_s18  }
  0xdd   : > { %s719_s25 = scalar_lea.sflag [#allocation4], %s718_s23 }
  0xde   : > { %p875_p7 = pnand %p878_p6, %p1093_p8 }
  0xe0   : > { %p876_p9 = pneg %p875_p7 }
  0xe2   : > { %985 = dma.done.wait (%p876_p9), %s719_s25, 256  }
  0xe3   : > { %987 = vsyncadd (%p876_p9), %s719_s25, 4294967040  ;;  %s18_s21 = sadd.s32 1, %s1010_s21   ;;  %s1196_s18 = smov %s994_s19 }
  0xe4   : > { %p15_p10 = scmp.ge.s32.totalorder %s18_s21, 4   ;;  %s1197_s19 = smov %s998_s20 }
  0xe5   : > { %s1198_s20 = smov %s1099_s29  ;;  %s1199_s1 = smov %s1006_s2 }
  0xe6   : > { %s1200_s2 = smov %s1202_s24  ;;  %17 = sbr.rel (!%p15_p10) target bundleno = 4 (0x4), region = 105 }
  0xeb   :  { %725 = vsyncpa [#allocation4], 1 }
  0xec   :  { %727 = vsyncpa [#allocation4 + $0x1], 1 }

</bundles_post_ra>
